<compile_context>
chip_gen: v7x
topology: tpu7x:2x2x1
jax: 0.10.0
libtpu: 0.0.40
codegen_flags: <defaults>
</compile_context>

<pallas_src>
import functools

import jax
import jax.numpy as jnp
from jax.experimental import pallas as pl
from jax.experimental.pallas import tpu as pltpu

LANE = 128


def _iou_kernel(x_ref, t_ref, inter_ref, total_ref, *,
                tr, rows, steps_per_core, nblocks, acc_sub,
                ragged_possible, skip_possible):
    """Grid = (nsplit cores, steps per core); outputs are per-core accumulators."""
    c = pl.program_id(0)
    i = pl.program_id(1)
    gb = c * steps_per_core + i          # unclamped global row-block index
    start = gb * tr                      # first row covered by this step

    @pl.when(i == 0)
    def _():
        inter_ref[...] = jnp.zeros_like(inter_ref)   # per-core sum(p * t) partials
        total_ref[...] = jnp.zeros_like(total_ref)   # per-core sum(p + t) partials

    x = x_ref[...].astype(jnp.float32)
    t = t_ref[...].astype(jnp.float32)
    # sigmoid(x) == 0.5 * tanh(0.5 * x) + 0.5  -> single transcendental on the EUP.
    p = 0.5 * jnp.tanh(0.5 * x) + 0.5

    def _accum(pv, tv):
        if acc_sub == 8:
            # Full-vreg VALU adds; sublane collapse deferred to the wrapper.
            pi = (pv * tv).reshape(tr // 8, 8, LANE).sum(axis=0)
            ps = (pv + tv).reshape(tr // 8, 8, LANE).sum(axis=0)
        else:
            pi = jnp.sum(pv * tv, axis=0, keepdims=True)
            ps = jnp.sum(pv + tv, axis=0, keepdims=True)
        inter_ref[...] += pi[None]
        total_ref[...] += ps[None]

    if not ragged_possible and not skip_possible:
        # Steady state: every block is full and owned by exactly one step.
        _accum(p, t)
    else:
        @pl.when(start + tr <= rows)          # full, in-bounds block (unmasked)
        def _():
            _accum(p, t)

        if ragged_possible:
            @pl.when(jnp.logical_and(start < rows, start + tr > rows))
            def _():                          # single overhanging block: mask rows
                rowid = start + jax.lax.broadcasted_iota(jnp.int32, (tr, LANE), 0)
                valid = rowid < rows
                _accum(jnp.where(valid, p, 0.0), jnp.where(valid, t, 0.0))
        # start >= rows (duplicate clamped block on the split): skip entirely.


def _default_tile_rows():
    try:
        kind = jax.devices()[0].device_kind.lower()
    except Exception:
        return 4096
    if "v7" in kind or "tpu7" in kind:
        return 8192   # ~4 MiB f32/block/input; overhead ~10% even at 3.2 TB/s
    return 4096       # ~2 MiB f32/block/input; fits v5e's 16 MiB default scoped VMEM


def iou_pallas(inputs, targets, smooth=1e-06, *, tile_rows=None):
    """Returns (iou, 1 - iou) as float32 scalars.

    Inputs/targets are streamed in their native dtype (bf16 logits / int8 or
    bool targets are welcome); the f32 cast happens in-kernel.
    """
    x = inputs.reshape(-1)
    t = targets.reshape(-1)
    n = x.shape[0]
    smooth = jnp.float32(smooth)

    if n == 0:
        # All sums are zero -> iou = smooth / smooth = 1.
        return jnp.float32(1.0), jnp.float32(0.0)

    if tile_rows is None:
        tile_rows = _default_tile_rows()

    rem = n % LANE
    main = n - rem

    # <=127-element tail handled with plain jnp in the wrapper: no full-array
    # jnp.pad / astype copy of the inputs before the memory-bound kernel.
    if rem:
        xt = x[main:].astype(jnp.float32)
        tt = t[main:].astype(jnp.float32)
        pt = jax.nn.sigmoid(xt)
        tail_inter = jnp.sum(pt * tt)
        tail_total = jnp.sum(pt) + jnp.sum(tt)
    else:
        tail_inter = jnp.float32(0.0)
        tail_total = jnp.float32(0.0)

    if main == 0:
        inter = tail_inter
        total = tail_total
    else:
        x2 = x[:main].reshape(-1, LANE)   # no-copy reshape of the leading slice
        t2 = t[:main].reshape(-1, LANE)
        rows = x2.shape[0]

        if rows <= tile_rows:
            tr = rows                     # single block == full array dims
        else:
            tr = max(8, (int(tile_rows) // 8) * 8)
        nblocks = -(-rows // tr)

        # Leading 2-way "parallel" axis: each TensorCore (v7x) owns half the
        # row blocks and its own output accumulator block.  On 1-TC chips this
        # is a plain sequential loop (accumulators re-init at i==0 per core).
        # Only split when the at-most-one duplicated clamped block is a small
        # fraction of the work.
        if nblocks >= 2 and (nblocks % 2 == 0 or nblocks >= 8):
            nsplit = 2
        else:
            nsplit = 1
        spc = -(-nblocks // nsplit)             # steps per core
        acc_sub = 8 if tr % 8 == 0 else 1       # (8,128) accs when tr allows
        ragged_possible = (rows % tr) != 0
        skip_possible = (nsplit * spc) != nblocks

        def in_map(c, i):
            # Clamp so the duplicated overhang step never DMAs out of bounds;
            # the kernel skips its accumulation via the unclamped index.
            return (jnp.minimum(c * spc + i, nblocks - 1), 0)

        kernel = functools.partial(
            _iou_kernel, tr=tr, rows=rows, steps_per_core=spc,
            nblocks=nblocks, acc_sub=acc_sub,
            ragged_possible=ragged_possible, skip_possible=skip_possible)

        inter_p, total_p = pl.pallas_call(
            kernel,
            out_shape=(
                jax.ShapeDtypeStruct((nsplit, acc_sub, LANE), jnp.float32),
                jax.ShapeDtypeStruct((nsplit, acc_sub, LANE), jnp.float32),
            ),
            grid_spec=pltpu.PrefetchScalarGridSpec(
                num_scalar_prefetch=0,
                grid=(nsplit, spc),
                in_specs=[
                    pl.BlockSpec((tr, LANE), in_map),
                    pl.BlockSpec((tr, LANE), in_map),
                ],
                out_specs=[
                    pl.BlockSpec((1, acc_sub, LANE), lambda c, i: (c, 0, 0)),
                    pl.BlockSpec((1, acc_sub, LANE), lambda c, i: (c, 0, 0)),
                ],
            ),
            compiler_params=pltpu.CompilerParams(
                dimension_semantics=("parallel", "arbitrary"),
                vmem_limit_bytes=32 * 1024 * 1024,
            ),
        )(x2, t2)

        inter = jnp.sum(inter_p) + tail_inter
        total = jnp.sum(total_p) + tail_total

    iou = (inter + smooth) / (total - inter + smooth)
    return iou, jnp.float32(1.0) - iou


def iou_reference(inputs, targets, smooth=1e-06):
    p = jax.nn.sigmoid(inputs.astype(jnp.float32)).reshape(-1)
    t = targets.astype(jnp.float32).reshape(-1)
    inter = jnp.sum(p * t)
    iou = (inter + smooth) / (jnp.sum(p) + jnp.sum(t) - inter + smooth)
    return iou, 1.0 - iou


def _check(x, t, **kw):
    iou, loss = iou_pallas(x, t, **kw)
    jax.block_until_ready((iou, loss))
    iou_ref, loss_ref = iou_reference(x, t)
    assert jnp.allclose(iou, iou_ref, rtol=1e-5, atol=1e-6), (iou, iou_ref)
    assert jnp.allclose(loss, loss_ref, rtol=1e-5, atol=1e-6), (loss, loss_ref)


if __name__ == "__main__":
    key = jax.random.PRNGKey(0)
    ks = jax.random.split(key, 10)

    # 1) NCHW logits + binary mask targets (typical segmentation setup).
    x = jax.random.normal(ks[0], (2, 4, 16, 16), dtype=jnp.float32)
    t = (jax.random.uniform(ks[1], (2, 4, 16, 16)) > 0.5).astype(jnp.float32)
    _check(x, t)

    # 2) Element count not a multiple of 128 -> wrapper-side tail sum path.
    x2 = jax.random.normal(ks[2], (1, 3, 10, 13), dtype=jnp.float32)
    t2 = (jax.random.uniform(ks[3], (1, 3, 10, 13)) > 0.5).astype(jnp.float32)
    _check(x2, t2)

    # 3) Multi-block grid with 2-way split + ragged last row-block + clamped
    #    duplicate block skip (tile_rows forced tiny to exercise it at small size).
    x3 = jax.random.normal(ks[4], (2, 4, 32, 33), dtype=jnp.float32)
    t3 = (jax.random.uniform(ks[5], (2, 4, 32, 33)) > 0.5).astype(jnp.float32)
    _check(x3, t3, tile_rows=8)

    # 4) Ragged lanes + multi-block split + masked ragged row-block together.
    x4 = jax.random.normal(ks[6], (1, 5, 37, 41), dtype=jnp.float32)
    t4 = (jax.random.uniform(ks[7], (1, 5, 37, 41)) > 0.5).astype(jnp.float32)
    _check(x4, t4, tile_rows=8)

    # 5) Narrow dtypes streamed natively (bf16 logits, int8 targets).
    x5 = jax.random.normal(ks[8], (2, 4, 32, 16), dtype=jnp.bfloat16)
    t5 = (jax.random.uniform(ks[9], (2, 4, 32, 16)) > 0.5).astype(jnp.int8)
    _check(x5, t5)

    print("KERNEL_OK")
</pallas_src>

<mosaic_0001>
module attributes {stable_mosaic.version = 11 : i64} {
  func.func @_iou_kernel(%arg0: i32, %arg1: i32, %arg2: memref<16x128xf32, #tpu.memory_space<vmem>>, %arg3: memref<16x128xf32, #tpu.memory_space<vmem>>, %arg4: memref<1x8x128xf32, #tpu.memory_space<vmem>>, %arg5: memref<1x8x128xf32, #tpu.memory_space<vmem>>) attributes {dimension_semantics = [#tpu.dimension_semantics<parallel>, #tpu.dimension_semantics<arbitrary>], iteration_bounds = array<i64: 1, 1>, scalar_prefetch = 0 : i64, scratch_operands = 0 : i64, tpu.core_type = #tpu.core_type<tc>, window_params = [{transform_indices = @transform_0, window_bounds = array<i64: 16, 128>}, {transform_indices = @transform_1, window_bounds = array<i64: 16, 128>}, {transform_indices = @transform_2, window_bounds = array<i64: 1, 8, 128>}, {transform_indices = @transform_3, window_bounds = array<i64: 1, 8, 128>}]} {
    %c0_i32 = arith.constant 0 : i32
    %0 = arith.cmpi eq, %arg1, %c0_i32 : i32
    %1 = arith.extui %0 : i1 to i32
    %c0_i32_0 = arith.constant 0 : i32
    %2 = arith.cmpi ne, %1, %c0_i32_0 : i32
    scf.if %2 {
      %cst_20 = arith.constant 0.000000e+00 : f32
      %26 = vector.broadcast %cst_20 : f32 to vector<1x8x128xf32>
      %c0_21 = arith.constant 0 : index
      %c0_22 = arith.constant 0 : index
      %c0_23 = arith.constant 0 : index
      %27 = vector.load %arg4[%c0_21, %c0_22, %c0_23] : memref<1x8x128xf32, #tpu.memory_space<vmem>>, vector<1x8x128xf32>
      tpu.vector_store %arg4[%c0_21, %c0_22, %c0_23], %26 {strides = array<i32>} : memref<1x8x128xf32, #tpu.memory_space<vmem>>, vector<1x8x128xf32>,
      %cst_24 = arith.constant 0.000000e+00 : f32
      %28 = vector.broadcast %cst_24 : f32 to vector<1x8x128xf32>
      %c0_25 = arith.constant 0 : index
      %c0_26 = arith.constant 0 : index
      %c0_27 = arith.constant 0 : index
      %29 = vector.load %arg5[%c0_25, %c0_26, %c0_27] : memref<1x8x128xf32, #tpu.memory_space<vmem>>, vector<1x8x128xf32>
      tpu.vector_store %arg5[%c0_25, %c0_26, %c0_27], %28 {strides = array<i32>} : memref<1x8x128xf32, #tpu.memory_space<vmem>>, vector<1x8x128xf32>,
    } else {
    }
    %c0 = arith.constant 0 : index
    %c0_1 = arith.constant 0 : index
    %3 = vector.load %arg2[%c0, %c0_1] : memref<16x128xf32, #tpu.memory_space<vmem>>, vector<16x128xf32>
    %c0_2 = arith.constant 0 : index
    %c0_3 = arith.constant 0 : index
    %4 = vector.load %arg3[%c0_2, %c0_3] : memref<16x128xf32, #tpu.memory_space<vmem>>, vector<16x128xf32>
    %cst = arith.constant 5.000000e-01 : f32
    %5 = vector.broadcast %cst : f32 to vector<16x128xf32>
    %6 = arith.mulf %5, %3 : vector<16x128xf32>
    %7 = math.tanh %6 : vector<16x128xf32>
    %cst_4 = arith.constant 5.000000e-01 : f32
    %8 = vector.broadcast %cst_4 : f32 to vector<16x128xf32>
    %9 = arith.mulf %8, %7 : vector<16x128xf32>
    %cst_5 = arith.constant 5.000000e-01 : f32
    %10 = vector.broadcast %cst_5 : f32 to vector<16x128xf32>
    %11 = arith.addf %9, %10 : vector<16x128xf32>
    %12 = arith.mulf %11, %4 : vector<16x128xf32>
    %13 = vector.shape_cast %12 : vector<16x128xf32> to vector<2x8x128xf32>
    %cst_6 = arith.constant dense<0.000000e+00> : vector<8x128xf32>
    %14 = vector.multi_reduction <add>, %13, %cst_6 [0] : vector<2x8x128xf32> to vector<8x128xf32>
    %15 = arith.addf %11, %4 : vector<16x128xf32>
    %16 = vector.shape_cast %15 : vector<16x128xf32> to vector<2x8x128xf32>
    %cst_7 = arith.constant dense<0.000000e+00> : vector<8x128xf32>
    %17 = vector.multi_reduction <add>, %16, %cst_7 [0] : vector<2x8x128xf32> to vector<8x128xf32>
    %c0_8 = arith.constant 0 : index
    %c0_9 = arith.constant 0 : index
    %c0_10 = arith.constant 0 : index
    %18 = vector.load %arg4[%c0_8, %c0_9, %c0_10] : memref<1x8x128xf32, #tpu.memory_space<vmem>>, vector<1x8x128xf32>
    %19 = vector.shape_cast %14 : vector<8x128xf32> to vector<1x8x128xf32>
    %20 = arith.addf %18, %19 : vector<1x8x128xf32>
    %c0_11 = arith.constant 0 : index
    %c0_12 = arith.constant 0 : index
    %c0_13 = arith.constant 0 : index
    %21 = vector.load %arg4[%c0_11, %c0_12, %c0_13] : memref<1x8x128xf32, #tpu.memory_space<vmem>>, vector<1x8x128xf32>
    tpu.vector_store %arg4[%c0_11, %c0_12, %c0_13], %20 {strides = array<i32>} : memref<1x8x128xf32, #tpu.memory_space<vmem>>, vector<1x8x128xf32>,
    %c0_14 = arith.constant 0 : index
    %c0_15 = arith.constant 0 : index
    %c0_16 = arith.constant 0 : index
    %22 = vector.load %arg5[%c0_14, %c0_15, %c0_16] : memref<1x8x128xf32, #tpu.memory_space<vmem>>, vector<1x8x128xf32>
    %23 = vector.shape_cast %17 : vector<8x128xf32> to vector<1x8x128xf32>
    %24 = arith.addf %22, %23 : vector<1x8x128xf32>
    %c0_17 = arith.constant 0 : index
    %c0_18 = arith.constant 0 : index
    %c0_19 = arith.constant 0 : index
    %25 = vector.load %arg5[%c0_17, %c0_18, %c0_19] : memref<1x8x128xf32, #tpu.memory_space<vmem>>, vector<1x8x128xf32>
    tpu.vector_store %arg5[%c0_17, %c0_18, %c0_19], %24 {strides = array<i32>} : memref<1x8x128xf32, #tpu.memory_space<vmem>>, vector<1x8x128xf32>,
    return
  }
  func.func @transform_0(%arg0: i32, %arg1: i32) -> (i32, i32) {
    %c1_i32 = arith.constant 1 : i32
    %0 = arith.muli %arg0, %c1_i32 : i32
    %1 = arith.addi %0, %arg1 : i32
    %c0_i32 = arith.constant 0 : i32
    %2 = arith.minsi %1, %c0_i32 : i32
    %c0_i32_0 = arith.constant 0 : i32
    %c0_i32_1 = arith.constant 0 : i32
    return %2, %c0_i32_0 : i32, i32
  }
  func.func @transform_1(%arg0: i32, %arg1: i32) -> (i32, i32) {
    %c1_i32 = arith.constant 1 : i32
    %0 = arith.muli %arg0, %c1_i32 : i32
    %1 = arith.addi %0, %arg1 : i32
    %c0_i32 = arith.constant 0 : i32
    %2 = arith.minsi %1, %c0_i32 : i32
    %c0_i32_0 = arith.constant 0 : i32
    %c0_i32_1 = arith.constant 0 : i32
    return %2, %c0_i32_0 : i32, i32
  }
  func.func @transform_2(%arg0: i32, %arg1: i32) -> (i32, i32, i32) {
    %c0_i32 = arith.constant 0 : i32
    %c0_i32_0 = arith.constant 0 : i32
    %c0_i32_1 = arith.constant 0 : i32
    return %arg0, %c0_i32, %c0_i32_0 : i32, i32, i32
  }
  func.func @transform_3(%arg0: i32, %arg1: i32) -> (i32, i32, i32) {
    %c0_i32 = arith.constant 0 : i32
    %c0_i32_0 = arith.constant 0 : i32
    %c0_i32_1 = arith.constant 0 : i32
    return %arg0, %c0_i32, %c0_i32_0 : i32, i32, i32
  }
}

</mosaic_0001>

<bundles_post_ra>
// kernel: tpu_custom_call.1
= control target key start
LH: loop header
LB: loop body
LE: loop exit
PB: predicated region body
PF: predicated region fallthrough
CT: control target
= control target key end

     0   :  { %9 = vsyncpa [#allocation3], 0  ;;  %s308_s0 = inlined_call_operand.hbm [shape: f32[16,128], index: 0, kind: input, shape index: {}]   ;;  %s309_s1 = inlined_call_operand.hbm [shape: f32[16,128], index: 1, kind: input, shape index: {}]   ;;  %s310_s2 = inlined_call_operand.hbm [shape: f32[1,8,128], index: 2, kind: output, shape index: {0}]   ;;  %s311_s3 = inlined_call_operand.hbm [shape: f32[1,8,128], index: 3, kind: output, shape index: {1}]  }
   0x1   :  { %10 = vsyncpa [#allocation6], 0 }
   0x2   :  { %11 = vsyncpa [#allocation4], 0 }
   0x3   :  { %12 = vsyncpa [#allocation9], 0  ;;  %s234_s12 = smov [#allocation2]   ;;  %s138_s16 = scalar_lea.hbm %s308_s0, 256 }
   0x4   :  { %s24_s13 = sshll.u32 %s234_s12, 4  ;;  %p139_p0 = scmp.ne.s32.totalorder %s308_s0, %s138_s16  ;;  %s25_s13 = int_to_ptr.vmem [resolvable:$true] %s24_s13 }
   0x5   :  { %p142_p1 = scmp.lt.u32.totalorder %s138_s16, %s308_s0 }
   0x7   :  { %p144_p2 = pnand %p142_p1, %p139_p0 }
   0x9   :  { %147 = shalt.err (!%p144_p2)
}
   0xa   :  { %s148_s21 = scalar_lea.vmem %s25_s13, 256  ;;  %p153_p4 = scmp.lt.s32.totalorder %s25_s13, %s25_s13 }
   0xb   :  { %p149_p3 = scmp.ne.s32.totalorder %s25_s13, %s148_s21  ;;  %p154_p5 = scmp.lt.s32.totalorder %s148_s21, %s148_s21 }
   0xd   :  { %p155_p6 = por %p154_p5, %p153_p4 }
   0xf   :  { %p156_p7 = pnand %p155_p6, %p149_p3 }
  0x11   :  { %159 = shalt.err (!%p156_p7)
}
  0x12   :  { %s235_s22 = smov 128   ;;  %s236_s23 = smov 8  }
  0x13   :  { %30 = dma.hbm_to_vmem [thread:$0]  %s308_s0, 256, %s25_s13, [#allocation3], %s235_s22, %s235_s22, %s236_s23  }
  0x14   :  { %s237_s26 = smov [#allocation5]   ;;  %s160_s30 = scalar_lea.hbm %s309_s1, 256 }
  0x15   :  { %s42_s27 = sshll.u32 %s237_s26, 4  ;;  %p161_p8 = scmp.ne.s32.totalorder %s309_s1, %s160_s30  ;;  %s43_s27 = int_to_ptr.vmem [resolvable:$true] %s42_s27 }
  0x16   :  { %p164_p9 = scmp.lt.u32.totalorder %s160_s30, %s309_s1 }
  0x18   :  { %p166_p10 = pnand %p164_p9, %p161_p8 }
  0x1a   :  { %169 = shalt.err (!%p166_p10)
}
  0x1b   :  { %s170_s8 = scalar_lea.vmem %s43_s27, 256  ;;  %p175_p12 = scmp.lt.s32.totalorder %s43_s27, %s43_s27 }
  0x1c   :  { %p171_p11 = scmp.ne.s32.totalorder %s43_s27, %s170_s8  ;;  %p176_p13 = scmp.lt.s32.totalorder %s170_s8, %s170_s8 }
  0x1e   :  { %p177_p0 = por %p176_p13, %p175_p12 }
  0x20   :  { %p178_p1 = pnand %p177_p0, %p171_p11 }
  0x22   :  { %181 = shalt.err (!%p178_p1)
}
  0x23   :  { %48 = dma.hbm_to_vmem [thread:$0]  %s309_s1, 256, %s43_s27, [#allocation6], %s235_s22, %s235_s22, %s236_s23  }
  0x24   :  { %226 = dma.done.wait [#allocation3], 256  }
  0x25   :  { %227 = vsyncadd [#allocation3], 4294967040 }
  0x26   :  { %228 = dma.done.wait [#allocation6], 256  }
  0x27   :  { %229 = vsyncadd [#allocation6], 4294967040  ;;  %v69_v0 = vld [vmem:[#allocation2] sm:$0xff]  ;;  %v70_v1 = vld [vmem:[#allocation2 + $0x8] sm:$0xff]  ;;  %s238_s1 = smov [#allocation7]   ;;  %s239_s11 = smov [#allocation8]  }
  0x28   :  { %v73_v2 = vmul.f32 0.5, %v69_v0  ;;  %v74_v3 = vmul.f32 0.5, %v70_v1  ;;  %v71_v7 = vld [vmem:[#allocation5] sm:$0xff]  ;;  %v72_v9 = vld [vmem:[#allocation5 + $0x8] sm:$0xff]  ;;  %s99_s10 = sshll.u32 %s238_s1, 4  ;;  %s109_s12 = sshll.u32 %s239_s11, 4  ;;  %s100_s10 = int_to_ptr.vmem [resolvable:$true] %s99_s10  ;;  %s110_s12 = int_to_ptr.vmem [resolvable:$true] %s109_s12 }
  0x29   :  { %s182_s13 = scalar_lea.vmem %s100_s10, 128  ;;  %p187_p3 = scmp.lt.s32.totalorder %s100_s10, %s100_s10 }
  0x2a   :  { %134 = vtanh.f32 %v73_v2  ;;  %p183_p2 = scmp.ne.s32.totalorder %s100_s10, %s182_s13  ;;  %p188_p4 = scmp.lt.s32.totalorder %s182_s13, %s182_s13 }
  0x2b   :  { %136 = vtanh.f32 %v74_v3 }
  0x2c   :  { %p189_p5 = por %p188_p4, %p187_p3 }
  0x2e   :  { %p190_p6 = pnand %p189_p5, %p183_p2 }
  0x34   :  { %v135_v4 = vpop.eup %134 }
  0x35   :  { %v137_v5 = vpop.eup %136  ;;  %v77_v6 = vmul.f32 0.5, %v135_v4 }
  0x36   :  { %v78_v8 = vmul.f32 0.5, %v137_v5 }
  0x37   :  { %v79_v10 = vadd.f32 0.5, %v77_v6 }
  0x38   :  { %v80_v11 = vadd.f32 0.5, %v78_v8 }
  0x39   :  { %v81_v12 = vmul.f32 %v79_v10, %v71_v7  ;;  %v84_v13 = vadd.f32 %v79_v10, %v71_v7 }
  0x3a   :  { %v82_v14 = vmul.f32 %v80_v11, %v72_v9  ;;  %v85_v15 = vadd.f32 %v80_v11, %v72_v9 }
  0x3c   :  { %v83_v16 = vadd.f32 %v82_v14, %v81_v12  ;;  %v86_v17 = vadd.f32 %v85_v15, %v84_v13 }
  0x3e   :  { %89 = vst [vmem:[#allocation7] sm:$0xff] %v83_v16  ;;  %92 = vst [vmem:[#allocation8] sm:$0xff] %v86_v17 }
  0x3f   :  { %193 = shalt.err (!%p190_p6)
}
  0x40   :  { %s194_s16 = scalar_lea.hbm %s310_s2, 128 }
  0x41   :  { %p195_p7 = scmp.ne.s32.totalorder %s310_s2, %s194_s16  ;;  %p198_p8 = scmp.lt.u32.totalorder %s194_s16, %s310_s2 }
  0x43   :  { %p200_p9 = pnand %p198_p8, %p195_p7 }
  0x45   :  { %203 = shalt.err (!%p200_p9)
}
  0x46   :  { %102 = dma.vmem_to_hbm [thread:$0]  %s100_s10, 128, %s310_s2, [#allocation4]  }
  0x47   :  { %s204_s23 = scalar_lea.vmem %s110_s12, 128  ;;  %p209_p11 = scmp.lt.s32.totalorder %s110_s12, %s110_s12 }
  0x48   :  { %p205_p10 = scmp.ne.s32.totalorder %s110_s12, %s204_s23  ;;  %p210_p12 = scmp.lt.s32.totalorder %s204_s23, %s204_s23 }
  0x4a   :  { %p211_p13 = por %p210_p12, %p209_p11 }
  0x4c   :  { %p212_p0 = pnand %p211_p13, %p205_p10 }
  0x4e   :  { %215 = shalt.err (!%p212_p0)
}
  0x4f   :  { %s216_s26 = scalar_lea.hbm %s311_s3, 128 }
  0x50   :  { %p217_p1 = scmp.ne.s32.totalorder %s311_s3, %s216_s26  ;;  %p220_p2 = scmp.lt.u32.totalorder %s216_s26, %s311_s3 }
  0x52   :  { %p222_p3 = pnand %p220_p2, %p217_p1 }
  0x54   :  { %225 = shalt.err (!%p222_p3)
}
  0x55   :  { %112 = dma.vmem_to_hbm [thread:$0]  %s110_s12, 128, %s311_s3, [#allocation9]  }
  0x56   :  { %230 = dma.done.wait [#allocation4], 128  }
  0x57   :  { %231 = vsyncadd [#allocation4], 4294967168 }
  0x58   :  { %232 = dma.done.wait [#allocation9], 128  }
  0x59   :  { %233 = vsyncadd [#allocation9], 4294967168 }
  0x5a   :  { %119 = vsyncpa [#allocation3], 1 }
  0x5b   :  { %120 = vsyncpa [#allocation6], 1 }
  0x5c   :  { %121 = vsyncpa [#allocation4], 1 }
  0x5d   :  { %122 = vsyncpa [#allocation9], 1 }

</bundles_post_ra>
